<compile_context>
chip_gen: v6e
topology: v6e:2x2x1
jax: 0.10.0
libtpu: 0.0.40
codegen_flags: <defaults>
</compile_context>

<pallas_src>
import jax
import jax.numpy as jnp
from jax import lax
from jax.experimental import pallas as pl
from jax.experimental.pallas import tpu as pltpu

_SUBLANES = 8
_TARGET_BLOCK_BYTES = 4 * 1024 * 1024      # per-input HBM->VMEM block target
_FULLH_ELEM_LIMIT = 1 << 20                # max un-tileable (H, W) slab elements
_CHUNK_ELEMS = 32 * 1024                   # f32 working set per streamed chunk


def _dice_partials_kernel(p_ref, t_ref, inter_ref, total_ref):
    """Accumulate per-slab partial sums of p*t and p+t into (Bnc, 8, W) blocks."""
    j = pl.program_id(2)                   # spatial (reduction) axis -- last

    @pl.when(j == 0)
    def _():
        inter_ref[...] = jnp.zeros_like(inter_ref)
        total_ref[...] = jnp.zeros_like(total_ref)

    bnc, th, w = p_ref.shape

    # Trace-time choice of a row chunk (multiple of 8 dividing TH) so the f32
    # working copies stay small even for multi-MiB input blocks.
    chunk = th
    if th % _SUBLANES == 0:
        chunk = _SUBLANES
        for cand in range(_SUBLANES, th + 1, _SUBLANES):
            if th % cand == 0 and bnc * cand * w <= _CHUNK_ELEMS:
                chunk = cand
    n_chunks = th // chunk

    def body(s, carry):
        acc_i, acc_t = carry
        r0 = s * chunk
        if chunk % _SUBLANES == 0:
            r0 = pl.multiple_of(r0, chunk)
        p = p_ref[:, pl.ds(r0, chunk), :].astype(jnp.float32)
        t = t_ref[:, pl.ds(r0, chunk), :].astype(jnp.float32)
        acc_i = acc_i + (p * t).sum(axis=1, keepdims=True)
        acc_t = acc_t + (p + t).sum(axis=1, keepdims=True)
        return acc_i, acc_t

    init = (jnp.zeros((bnc, 1, w), jnp.float32),
            jnp.zeros((bnc, 1, w), jnp.float32))
    acc_i, acc_t = lax.fori_loop(0, n_chunks, body, init)

    # Only sublane 0 of the (Bnc, 8, W) output blocks carries data; the rest
    # stays zero and is folded in by the wrapper reduction.
    inter_ref[:, 0:1, :] += acc_i
    total_ref[:, 0:1, :] += acc_t


def dice_loss(output, y_true, compare_rule='>', thr=0.95):
    """Forward pass of the PyTorch DiceLoss module (mean over channels of 1 - DSC).

    compare_rule / thr are accepted for signature parity; like the reference
    forward they are unused.
    """
    assert output.shape == y_true.shape and output.ndim >= 3
    n, c = output.shape[0], output.shape[1]
    w = output.shape[-1]
    h = 1
    for d in output.shape[2:-1]:
        h *= d
    nc = n * c
    itemsize = max(jnp.dtype(output.dtype).itemsize, jnp.dtype(y_true.dtype).itemsize)

    # Merge leading dims only: the (H, W) minor-dim layout is untouched, so
    # this reshape is free (no relayout, no pad copy).
    p3d = output.reshape(nc, h, w)
    t3d = y_true.reshape(nc, h, w)

    # ---- choose the spatial tile TH (rows of H per block) -------------------
    slab_bytes = h * w * itemsize
    h_eff = h
    if h % _SUBLANES == 0 and slab_bytes > _TARGET_BLOCK_BYTES:
        # Largest multiple-of-8 divisor of H whose block fits the target budget.
        th = _SUBLANES
        for cand in range(_SUBLANES, h + 1, _SUBLANES):
            if cand * w * itemsize > _TARGET_BLOCK_BYTES:
                break
            if h % cand == 0:
                th = cand
    elif h % _SUBLANES != 0 and h * w > _FULLH_ELEM_LIMIT:
        # Rare fallback: H cannot be tiled (not a multiple of 8) and a full-H
        # block would be too large -> zero-pad H (sum-neutral).  This is the
        # only path that pays an extra HBM pass.
        th = max(_SUBLANES,
                 (_TARGET_BLOCK_BYTES // max(1, w * itemsize))
                 // _SUBLANES * _SUBLANES)
        h_eff = -(-h // th) * th
        pad = ((0, 0), (0, h_eff - h), (0, 0))
        p3d = jnp.pad(p3d, pad)
        t3d = jnp.pad(t3d, pad)
    else:
        th = h
    h_blocks = h_eff // th

    # ---- fuse (n, c) slabs per block when the spatial slab is small ---------
    bnc = 1
    for cand in range(1, nc + 1):
        if cand * th * w * itemsize > _TARGET_BLOCK_BYTES:
            break
        if nc % cand == 0:
            bnc = cand
    nc_blocks = nc // bnc

    # ---- if there is a single (n,c) block, split the spatial reduction over a
    # leading parallel axis so both v7x TensorCores stay busy ------------------
    split = 2 if (nc_blocks == 1 and h_blocks >= 2 and h_blocks % 2 == 0) else 1
    hpp = h_blocks // split

    out_sds = jax.ShapeDtypeStruct((nc, split * _SUBLANES, w), jnp.float32)

    # Right-sized VMEM request: 2 inputs x 2 buffers x block + outputs + working set.
    in_block_bytes = bnc * th * w * itemsize
    out_block_bytes = bnc * _SUBLANES * w * 4
    if th % _SUBLANES == 0:
        work_bytes = 8 << 20                       # chunked streaming
    else:
        work_bytes = 6 * bnc * th * w * 4 + (4 << 20)   # un-chunked f32 copies
    vmem_bytes = 4 * in_block_bytes + 4 * out_block_bytes + work_bytes
    vmem_bytes = int(min(max(vmem_bytes, 16 << 20), 64 << 20))

    inter_p, total_p = pl.pallas_call(
        _dice_partials_kernel,
        out_shape=(out_sds, out_sds),
        grid_spec=pltpu.PrefetchScalarGridSpec(
            num_scalar_prefetch=0,
            grid=(split, nc_blocks, hpp),          # reduction axis last
            in_specs=[
                pl.BlockSpec((bnc, th, w), lambda p, i, j: (i, p * hpp + j, 0)),
                pl.BlockSpec((bnc, th, w), lambda p, i, j: (i, p * hpp + j, 0)),
            ],
            out_specs=(
                pl.BlockSpec((bnc, _SUBLANES, w), lambda p, i, j: (i, p, 0)),
                pl.BlockSpec((bnc, _SUBLANES, w), lambda p, i, j: (i, p, 0)),
            ),
        ),
        compiler_params=pltpu.CompilerParams(
            dimension_semantics=("parallel", "parallel", "arbitrary"),
            vmem_limit_bytes=vmem_bytes,
        ),
    )(p3d, t3d)

    # Tiny finalization in plain JAX (O(N*C*8*W) elements).
    smooth = jnp.float32(1e-9)
    inter = inter_p.reshape(n, c, -1).sum(axis=(0, 2))      # (C,)
    total = total_p.reshape(n, c, -1).sum(axis=(0, 2))      # (C,) = sum(p)+sum(t)
    dsc = (2.0 * inter + smooth) / (total + smooth)
    return jnp.mean(1.0 - dsc)


def _dice_loss_ref(output, y_true):
    smooth = 1e-9
    num = output.shape[1]
    loss = 0.0
    for ci in range(num):
        pred_flat = output[:, ci].reshape(-1)
        true_flat = y_true[:, ci].reshape(-1)
        inter = jnp.sum(pred_flat * true_flat)
        dsc = (2.0 * inter + smooth) / (jnp.sum(pred_flat) + jnp.sum(true_flat) + smooth)
        loss = loss + (1.0 - dsc)
    return loss / num


if __name__ == "__main__":
    key = jax.random.PRNGKey(0)
    k1, k2, k3, k4 = jax.random.split(key, 4)

    # Primary test: canonical small shape for the module.
    N, C, H, W = 2, 4, 16, 16
    output = jax.nn.sigmoid(jax.random.normal(k1, (N, C, H, W), dtype=jnp.float32))
    y_true = (jax.random.uniform(k2, (N, C, H, W), dtype=jnp.float32) > 0.5).astype(jnp.float32)
    loss = jax.jit(dice_loss)(output, y_true)
    jax.block_until_ready(loss)
    ref = _dice_loss_ref(output, y_true)
    assert jnp.allclose(loss, ref, rtol=1e-5, atol=1e-6), (loss, ref)

    # Large single-channel shape: exercises H tiling + the dual-core split path.
    big_p = jax.nn.sigmoid(jax.random.normal(k3, (1, 1, 2048, 1024), dtype=jnp.float32))
    big_t = (jax.random.uniform(k4, (1, 1, 2048, 1024), dtype=jnp.float32) > 0.5).astype(jnp.float32)
    loss_big = jax.jit(dice_loss)(big_p, big_t)
    jax.block_until_ready(loss_big)
    ref_big = _dice_loss_ref(big_p, big_t)
    assert jnp.allclose(loss_big, ref_big, rtol=1e-4, atol=1e-6), (loss_big, ref_big)

    # Odd, non-aligned spatial shape: exercises full-H blocks + slab fusion.
    odd_p = jax.nn.sigmoid(jax.random.normal(k1, (2, 3, 15, 20), dtype=jnp.float32))
    odd_t = (jax.random.uniform(k2, (2, 3, 15, 20), dtype=jnp.float32) > 0.5).astype(jnp.float32)
    loss_odd = jax.jit(dice_loss)(odd_p, odd_t)
    jax.block_until_ready(loss_odd)
    ref_odd = _dice_loss_ref(odd_p, odd_t)
    assert jnp.allclose(loss_odd, ref_odd, rtol=1e-5, atol=1e-6), (loss_odd, ref_odd)

    # bf16 inputs stream straight into the kernel (upcast on load, no pre-cast).
    bf_p = jax.nn.sigmoid(jax.random.normal(k3, (2, 2, 32, 128), dtype=jnp.float32)).astype(jnp.bfloat16)
    bf_t = (jax.random.uniform(k4, (2, 2, 32, 128), dtype=jnp.float32) > 0.5).astype(jnp.bfloat16)
    loss_bf = jax.jit(dice_loss)(bf_p, bf_t)
    jax.block_until_ready(loss_bf)
    ref_bf = _dice_loss_ref(bf_p.astype(jnp.float32), bf_t.astype(jnp.float32))
    assert jnp.allclose(loss_bf, ref_bf, rtol=1e-4, atol=1e-5), (loss_bf, ref_bf)

    print("KERNEL_OK")
</pallas_src>

<mosaic_0001>
module attributes {stable_mosaic.version = 11 : i64} {
  func.func @_dice_partials_kernel(%arg0: i32, %arg1: i32, %arg2: i32, %arg3: memref<8x16x16xf32, #tpu.memory_space<vmem>>, %arg4: memref<8x16x16xf32, #tpu.memory_space<vmem>>, %arg5: memref<8x8x16xf32, #tpu.memory_space<vmem>>, %arg6: memref<8x8x16xf32, #tpu.memory_space<vmem>>) attributes {dimension_semantics = [#tpu.dimension_semantics<parallel>, #tpu.dimension_semantics<parallel>, #tpu.dimension_semantics<arbitrary>], iteration_bounds = array<i64: 1, 1, 1>, scalar_prefetch = 0 : i64, scratch_operands = 0 : i64, tpu.core_type = #tpu.core_type<tc>, window_params = [{transform_indices = @transform_0, window_bounds = array<i64: 8, 16, 16>}, {transform_indices = @transform_1, window_bounds = array<i64: 8, 16, 16>}, {transform_indices = @transform_2, window_bounds = array<i64: 8, 8, 16>}, {transform_indices = @transform_3, window_bounds = array<i64: 8, 8, 16>}]} {
    %c0_i32 = arith.constant 0 : i32
    %0 = arith.cmpi eq, %arg2, %c0_i32 : i32
    %1 = arith.extui %0 : i1 to i32
    %c0_i32_0 = arith.constant 0 : i32
    %2 = arith.cmpi ne, %1, %c0_i32_0 : i32
    scf.if %2 {
      %cst_20 = arith.constant 0.000000e+00 : f32
      %25 = vector.broadcast %cst_20 : f32 to vector<8x8x16xf32>
      %c0_21 = arith.constant 0 : index
      %c0_22 = arith.constant 0 : index
      %c0_23 = arith.constant 0 : index
      %26 = vector.load %arg5[%c0_21, %c0_22, %c0_23] : memref<8x8x16xf32, #tpu.memory_space<vmem>>, vector<8x8x16xf32>
      tpu.vector_store %arg5[%c0_21, %c0_22, %c0_23], %25 {strides = array<i32>} : memref<8x8x16xf32, #tpu.memory_space<vmem>>, vector<8x8x16xf32>,
      %cst_24 = arith.constant 0.000000e+00 : f32
      %27 = vector.broadcast %cst_24 : f32 to vector<8x8x16xf32>
      %c0_25 = arith.constant 0 : index
      %c0_26 = arith.constant 0 : index
      %c0_27 = arith.constant 0 : index
      %28 = vector.load %arg6[%c0_25, %c0_26, %c0_27] : memref<8x8x16xf32, #tpu.memory_space<vmem>>, vector<8x8x16xf32>
      tpu.vector_store %arg6[%c0_25, %c0_26, %c0_27], %27 {strides = array<i32>} : memref<8x8x16xf32, #tpu.memory_space<vmem>>, vector<8x8x16xf32>,
    } else {
    }
    %cst = arith.constant 0.000000e+00 : f32
    %3 = vector.broadcast %cst : f32 to vector<8x1x16xf32>
    %cst_1 = arith.constant 0.000000e+00 : f32
    %4 = vector.broadcast %cst_1 : f32 to vector<8x1x16xf32>
    %c0_i32_2 = arith.constant 0 : i32
    %c16_i32 = arith.constant 16 : i32
    %5 = arith.muli %c0_i32_2, %c16_i32 : i32
    %6 = tpu.assume_multiple %5, 16 : i32
    %c0 = arith.constant 0 : index
    %7 = arith.index_cast %6 : i32 to index
    %c0_3 = arith.constant 0 : index
    %8 = vector.load %arg3[%c0, %7, %c0_3] : memref<8x16x16xf32, #tpu.memory_space<vmem>>, vector<8x16x16xf32>
    %c0_4 = arith.constant 0 : index
    %9 = arith.index_cast %6 : i32 to index
    %c0_5 = arith.constant 0 : index
    %10 = vector.load %arg4[%c0_4, %9, %c0_5] : memref<8x16x16xf32, #tpu.memory_space<vmem>>, vector<8x16x16xf32>
    %11 = arith.mulf %8, %10 : vector<8x16x16xf32>
    %cst_6 = arith.constant dense<0.000000e+00> : vector<8x16xf32>
    %12 = vector.multi_reduction <add>, %11, %cst_6 [1] : vector<8x16x16xf32> to vector<8x16xf32>
    %13 = vector.shape_cast %12 : vector<8x16xf32> to vector<8x1x16xf32>
    %14 = arith.addf %3, %13 : vector<8x1x16xf32>
    %15 = arith.addf %8, %10 : vector<8x16x16xf32>
    %cst_7 = arith.constant dense<0.000000e+00> : vector<8x16xf32>
    %16 = vector.multi_reduction <add>, %15, %cst_7 [1] : vector<8x16x16xf32> to vector<8x16xf32>
    %17 = vector.shape_cast %16 : vector<8x16xf32> to vector<8x1x16xf32>
    %18 = arith.addf %4, %17 : vector<8x1x16xf32>
    %c1_i32 = arith.constant 1 : i32
    %c0_8 = arith.constant 0 : index
    %c0_9 = arith.constant 0 : index
    %c0_10 = arith.constant 0 : index
    %19 = vector.load %arg5[%c0_8, %c0_9, %c0_10] : memref<8x8x16xf32, #tpu.memory_space<vmem>>, vector<8x1x16xf32>
    %20 = arith.addf %19, %14 : vector<8x1x16xf32>
    %c0_11 = arith.constant 0 : index
    %c0_12 = arith.constant 0 : index
    %c0_13 = arith.constant 0 : index
    %21 = vector.load %arg5[%c0_11, %c0_12, %c0_13] : memref<8x8x16xf32, #tpu.memory_space<vmem>>, vector<8x1x16xf32>
    tpu.vector_store %arg5[%c0_11, %c0_12, %c0_13], %20 {strides = array<i32>} : memref<8x8x16xf32, #tpu.memory_space<vmem>>, vector<8x1x16xf32>,
    %c0_14 = arith.constant 0 : index
    %c0_15 = arith.constant 0 : index
    %c0_16 = arith.constant 0 : index
    %22 = vector.load %arg6[%c0_14, %c0_15, %c0_16] : memref<8x8x16xf32, #tpu.memory_space<vmem>>, vector<8x1x16xf32>
    %23 = arith.addf %22, %18 : vector<8x1x16xf32>
    %c0_17 = arith.constant 0 : index
    %c0_18 = arith.constant 0 : index
    %c0_19 = arith.constant 0 : index
    %24 = vector.load %arg6[%c0_17, %c0_18, %c0_19] : memref<8x8x16xf32, #tpu.memory_space<vmem>>, vector<8x1x16xf32>
    tpu.vector_store %arg6[%c0_17, %c0_18, %c0_19], %23 {strides = array<i32>} : memref<8x8x16xf32, #tpu.memory_space<vmem>>, vector<8x1x16xf32>,
    return
  }
  func.func @transform_0(%arg0: i32, %arg1: i32, %arg2: i32) -> (i32, i32, i32) {
    %c1_i32 = arith.constant 1 : i32
    %0 = arith.muli %arg0, %c1_i32 : i32
    %1 = arith.addi %0, %arg2 : i32
    %c0_i32 = arith.constant 0 : i32
    %c0_i32_0 = arith.constant 0 : i32
    return %arg1, %1, %c0_i32 : i32, i32, i32
  }
  func.func @transform_1(%arg0: i32, %arg1: i32, %arg2: i32) -> (i32, i32, i32) {
    %c1_i32 = arith.constant 1 : i32
    %0 = arith.muli %arg0, %c1_i32 : i32
    %1 = arith.addi %0, %arg2 : i32
    %c0_i32 = arith.constant 0 : i32
    %c0_i32_0 = arith.constant 0 : i32
    return %arg1, %1, %c0_i32 : i32, i32, i32
  }
  func.func @transform_2(%arg0: i32, %arg1: i32, %arg2: i32) -> (i32, i32, i32) {
    %c0_i32 = arith.constant 0 : i32
    %c0_i32_0 = arith.constant 0 : i32
    return %arg1, %arg0, %c0_i32 : i32, i32, i32
  }
  func.func @transform_3(%arg0: i32, %arg1: i32, %arg2: i32) -> (i32, i32, i32) {
    %c0_i32 = arith.constant 0 : i32
    %c0_i32_0 = arith.constant 0 : i32
    return %arg1, %arg0, %c0_i32 : i32, i32, i32
  }
}

</mosaic_0001>

<bundles_post_ra>
// kernel: dice_loss.1
= control target key start
LH: loop header
LB: loop body
LE: loop exit
PB: predicated region body
PF: predicated region fallthrough
CT: control target
= control target key end

     0   :  { %9 = vsyncpa [#allocation3], 0  ;;  %s752_s0 = inlined_call_operand.hbm [shape: f32[8,16,16], index: 0, kind: input, shape index: {}]   ;;  %s753_s1 = inlined_call_operand.hbm [shape: f32[8,16,16], index: 1, kind: input, shape index: {}]   ;;  %s754_s2 = inlined_call_operand.vmem [shape: f32[8,8,16], index: 2, kind: output, shape index: {0}]   ;;  %s755_s3 = inlined_call_operand.vmem [shape: f32[8,8,16], index: 3, kind: output, shape index: {1}]  }
   0x1   :  { %10 = vsyncpa [#allocation5], 0  ;;  %s407_s12 = smov [#allocation2]  }
   0x2   :  { %s20_s13 = sshll.u32 %s407_s12, 4  ;;  %s21_s13 = int_to_ptr.vmem [resolvable:$true] %s20_s13 }
   0x3   :  { %s371_s14 = scalar_lea.vmem %s21_s13, 2048  ;;  %p376_p1 = scmp.lt.s32.totalorder %s21_s13, %s21_s13 }
   0x4   :  { %p372_p0 = scmp.ne.s32.totalorder %s21_s13, %s371_s14  ;;  %p377_p2 = scmp.lt.s32.totalorder %s371_s14, %s371_s14 }
   0x6   :  { %p378_p3 = por %p377_p2, %p376_p1 }
   0x8   :  { %p379_p4 = pnand %p378_p3, %p372_p0 }
   0xa   :  { %382 = shalt.err (!%p379_p4)
}
   0xb   :  { %s408_s15 = smov 128   ;;  %s409_s16 = smov 8  }
   0xc   :  { %26 = dma.hbm_to_vmem [thread:$0]  %s752_s0, 2048, %s21_s13, [#allocation3], %s408_s15, %s408_s15, %s409_s16  }
   0xd   :  { %s410_s19 = smov [#allocation4]  }
   0xe   :  { %s36_s20 = sshll.u32 %s410_s19, 4  ;;  %s37_s20 = int_to_ptr.vmem [resolvable:$true] %s36_s20 }
   0xf   :  { %s391_s21 = scalar_lea.vmem %s37_s20, 2048  ;;  %p396_p6 = scmp.lt.s32.totalorder %s37_s20, %s37_s20 }
  0x10   :  { %p392_p5 = scmp.ne.s32.totalorder %s37_s20, %s391_s21  ;;  %p397_p7 = scmp.lt.s32.totalorder %s391_s21, %s391_s21 }
  0x12   :  { %p398_p8 = por %p397_p7, %p396_p6 }
  0x14   :  { %p399_p9 = pnand %p398_p8, %p392_p5 }
  0x16   :  { %402 = shalt.err (!%p399_p9)
}
  0x17   :  { %42 = dma.hbm_to_vmem [thread:$0]  %s753_s1, 2048, %s37_s20, [#allocation5], %s408_s15, %s408_s15, %s409_s16  }
  0x18   :  { %403 = dma.done.wait [#allocation3], 2048  }
  0x19   :  { %404 = vsyncadd [#allocation3], 4294965248 }
  0x1a   :  { %405 = dma.done.wait [#allocation5], 2048  }
  0x1b   :  { %406 = vsyncadd [#allocation5], 4294965248  ;;  %vm57_vm0 = vcmask 130048   ;;  %v411_v0 = vmov 0.0   ;;  %v74_v1 = vld [vmem:[#allocation2] sm:$0xff]  ;;  %v75_v2 = vld [vmem:[#allocation2 + $0x8] sm:$0xff] }
  0x1c   :  { %58 = vst.msk [vmem:[%s754_s2] sm:$0xff] %vm57_vm0, %v411_v0  ;;  %59 = vst.msk [vmem:[%s754_s2 + $0x8] sm:$0xff] %vm57_vm0, %v411_v0  ;;  %v90_v3 = vld [vmem:[#allocation4] sm:$0xff]  ;;  %v91_v4 = vld [vmem:[#allocation4 + $0x8] sm:$0xff]  ;;  %vm315_vm1 = vcmask 122880  }
  0x1d   :  { %60 = vst.msk [vmem:[%s754_s2 + $0x10] sm:$0xff] %vm57_vm0, %v411_v0  ;;  %61 = vst.msk [vmem:[%s754_s2 + $0x18] sm:$0xff] %vm57_vm0, %v411_v0  ;;  %v106_v5 = vmul.f32 %v90_v3, %v74_v1  ;;  %v76_v6 = vld [vmem:[#allocation2 + $0x10] sm:$0xff]  ;;  %v203_v7 = vadd.f32 %v90_v3, %v74_v1  ;;  %v107_v8 = vmul.f32 %v91_v4, %v75_v2  ;;  %v77_v9 = vld [vmem:[#allocation2 + $0x18] sm:$0xff] }
  0x1e   :  { %62 = vst.msk [vmem:[%s754_s2 + $0x20] sm:$0xff] %vm57_vm0, %v411_v0  ;;  %63 = vst.msk [vmem:[%s754_s2 + $0x28] sm:$0xff] %vm57_vm0, %v411_v0  ;;  %v92_v10 = vld [vmem:[#allocation4 + $0x10] sm:$0xff]  ;;  %v93_v11 = vld [vmem:[#allocation4 + $0x18] sm:$0xff]  ;;  %v204_v12 = vadd.f32 %v91_v4, %v75_v2 }
  0x1f   :  { %64 = vst.msk [vmem:[%s754_s2 + $0x30] sm:$0xff] %vm57_vm0, %v411_v0  ;;  %65 = vst.msk [vmem:[%s754_s2 + $0x38] sm:$0xff] %vm57_vm0, %v411_v0  ;;  %v123_v13 = vsel %vm57_vm0, %v106_v5, 0.0  ;;  %v108_v14 = vmul.f32 %v92_v10, %v76_v6  ;;  %v109_v15 = vmul.f32 %v93_v11, %v77_v9  ;;  %v503_v16 = vld [vmem:[#allocation2 + $0x20] sm:$0xff]  ;;  %v505_v17 = vld [vmem:[#allocation2 + $0x28] sm:$0xff]  ;;  %v219_v18 = vsel %vm57_vm0, %v203_v7, 0.0 }
  0x20   :  { %66 = vst.msk [vmem:[%s755_s3] sm:$0xff] %vm57_vm0, %v411_v0  ;;  %67 = vst.msk [vmem:[%s755_s3 + $0x8] sm:$0xff] %vm57_vm0, %v411_v0  ;;  %v124_v19 = vsel %vm57_vm0, %v107_v8, 0.0  ;;  %v509_v20 = vld [vmem:[#allocation4 + $0x20] sm:$0xff]  ;;  %v511_v21 = vld [vmem:[#allocation4 + $0x28] sm:$0xff]  ;;  %v220_v22 = vsel %vm57_vm0, %v204_v12, 0.0  ;;  %v205_v23 = vadd.f32 %v92_v10, %v76_v6  ;;  %v514_v24 = vadd.f32 %v93_v11, %v77_v9 }
  0x21   :  { %68 = vst.msk [vmem:[%s755_s3 + $0x10] sm:$0xff] %vm57_vm0, %v411_v0  ;;  %69 = vst.msk [vmem:[%s755_s3 + $0x18] sm:$0xff] %vm57_vm0, %v411_v0  ;;  %v125_v25 = vadd.f32 %v124_v19, %v123_v13  ;;  %v132_v26 = vsel %vm57_vm0, %v108_v14, 0.0  ;;  %v133_v27 = vsel %vm57_vm0, %v109_v15, 0.0  ;;  %v110_v28 = vmul.f32 %v509_v20, %v503_v16  ;;  %v520_v29 = vld [vmem:[#allocation2 + $0x30] sm:$0xff]  ;;  %v522_v30 = vld [vmem:[#allocation2 + $0x38] sm:$0xff] }
  0x22   :  { %70 = vst.msk [vmem:[%s755_s3 + $0x20] sm:$0xff] %vm57_vm0, %v411_v0  ;;  %71 = vst.msk [vmem:[%s755_s3 + $0x28] sm:$0xff] %vm57_vm0, %v411_v0  ;;  %v524_v31 = vld [vmem:[#allocation4 + $0x30] sm:$0xff]  ;;  %v134_v32 = vadd.f32 %v133_v27, %v132_v26  ;;  %v111_v33 = vmul.f32 %v511_v21, %v505_v17  ;;  %v528_v34 = vld [vmem:[#allocation4 + $0x38] sm:$0xff]  ;;  %v534_v37 = vadd.f32 %v220_v22, %v219_v18  ;;  %v546_v44 = vsel %vm57_vm0, %v205_v23, 0.0 }
  0x23   :  { %72 = vst.msk [vmem:[%s755_s3 + $0x30] sm:$0xff] %vm57_vm0, %v411_v0  ;;  %73 = vst.msk [vmem:[%s755_s3 + $0x38] sm:$0xff] %vm57_vm0, %v411_v0  ;;  %v112_v35 = vmul.f32 %v524_v31, %v520_v29  ;;  %v532_v36 = vld [vmem:[#allocation2 + $0x40] sm:$0xff]  ;;  %v126_v38 = vrot.slane %v125_v25, 4  ;;  %v141_v39 = vsel %vm57_vm0, %v110_v28, 0.0  ;;  %v113_v40 = vmul.f32 %v528_v34, %v522_v30  ;;  %v539_v41 = vld [vmem:[#allocation2 + $0x48] sm:$0xff] }
  0x24   :  { %v541_v42 = vld [vmem:[#allocation4 + $0x40] sm:$0xff]  ;;  %v543_v43 = vld [vmem:[#allocation4 + $0x48] sm:$0xff]  ;;  %v135_v45 = vrot.slane %v134_v32, 4  ;;  %v142_v46 = vsel %vm57_vm0, %v111_v33, 0.0  ;;  %v552_v49 = vld [vmem:[#allocation2 + $0x50] sm:$0xff] }
  0x25   :  { %v150_v47 = vsel %vm57_vm0, %v112_v35, 0.0  ;;  %v114_v48 = vmul.f32 %v541_v42, %v532_v36  ;;  %v127_v50 = vadd.f32 %v126_v38, %v125_v25  ;;  %v143_v51 = vadd.f32 %v142_v46, %v141_v39  ;;  %v557_v54 = vld [vmem:[#allocation2 + $0x58] sm:$0xff]  ;;  %v559_v55 = vld [vmem:[#allocation4 + $0x50] sm:$0xff]  ;;  %v566_v61 = vld [vmem:[#allocation2 + $0x60] sm:$0xff] }
  0x26   :  { %v151_v52 = vsel %vm57_vm0, %v113_v40, 0.0  ;;  %v115_v53 = vmul.f32 %v543_v43, %v539_v41  ;;  %v561_v56 = vld [vmem:[#allocation4 + $0x58] sm:$0xff]  ;;  %v136_v57 = vadd.f32 %v135_v45, %v134_v32  ;;  %v116_v60 = vmul.f32 %v559_v55, %v552_v49  ;;  %v571_v2 = vld [vmem:[#allocation4 + $0x60] sm:$0xff]  ;;  %v574_v7 = vld [vmem:[#allocation2 + $0x68] sm:$0xff] }
  0x27   :  { %v152_v58 = vadd.f32 %v151_v52, %v150_v47  ;;  %v159_v59 = vsel %vm57_vm0, %v114_v48, 0.0  ;;  %v128_v62 = vrot.slane %v127_v50, 2  ;;  %v144_v63 = vrot.slane %v143_v51, 4  ;;  %v576_v8 = vld [vmem:[#allocation4 + $0x68] sm:$0xff]  ;;  %v581_v19 = vld [vmem:[#allocation2 + $0x70] sm:$0xff]  ;;  %v591_v39 = vld [vmem:[#allocation2 + $0x78] sm:$0xff] }
  0x28   :  { %v160_v0 = vsel %vm57_vm0, %v115_v53, 0.0  ;;  %v117_v1 = vmul.f32 %v561_v56, %v557_v54  ;;  %v137_v3 = vrot.slane %v136_v57, 2  ;;  %v168_v6 = vsel %vm57_vm0, %v116_v60, 0.0  ;;  %v583_v22 = vld [vmem:[#allocation4 + $0x70] sm:$0xff]  ;;  %v299_v25 = vld [vmem:[%s754_s2] sm:$0x1] }
  0x29   :  { %v153_v4 = vrot.slane %v152_v58, 4  ;;  %v161_v5 = vadd.f32 %v160_v0, %v159_v59  ;;  %v129_v9 = vadd.f32 %v128_v62, %v127_v50  ;;  %v145_v10 = vadd.f32 %v144_v63, %v143_v51  ;;  %v593_v40 = vld [vmem:[#allocation4 + $0x78] sm:$0xff]  ;;  %v300_v46 = vld [vmem:[%s754_s2 + $0x8] sm:$0x1]  ;;  %v301_v0 = vld [vmem:[%s754_s2 + $0x10] sm:$0x1] }
  0x2a   :  { %v169_v11 = vsel %vm57_vm0, %v117_v1, 0.0  ;;  %v118_v12 = vmul.f32 %v571_v2, %v566_v61  ;;  %v138_v13 = vadd.f32 %v137_v3, %v136_v57  ;;  %v119_v27 = vmul.f32 %v576_v8, %v574_v7 }
  0x2b   :  { %v154_v14 = vadd.f32 %v153_v4, %v152_v58  ;;  %v162_v15 = vrot.slane %v161_v5, 4  ;;  %v170_v18 = vadd.f32 %v169_v11, %v168_v6  ;;  %v130_v23 = vrot.slane %v129_v9, 1  ;;  %v302_v6 = vld [vmem:[%s754_s2 + $0x18] sm:$0x1] }
  0x2c   :  { %v146_v26 = vrot.slane %v145_v10, 2  ;;  %v177_v28 = vsel %vm57_vm0, %v118_v12, 0.0  ;;  %v139_v32 = vrot.slane %v138_v13, 1  ;;  %v178_v48 = vsel %vm57_vm0, %v119_v27, 0.0 }
  0x2d   :  { %v155_v33 = vrot.slane %v154_v14, 2  ;;  %v163_v35 = vadd.f32 %v162_v15, %v161_v5  ;;  %v171_v38 = vrot.slane %v170_v18, 4  ;;  %v131_v45 = vadd.f32 %v130_v23, %v129_v9  ;;  %v303_v23 = vld [vmem:[%s754_s2 + $0x20] sm:$0x1] }
  0x2e   :  { %v147_v47 = vadd.f32 %v146_v26, %v145_v10  ;;  %v120_v50 = vmul.f32 %v583_v22, %v581_v19  ;;  %v140_v51 = vadd.f32 %v139_v32, %v138_v13  ;;  %v179_v60 = vadd.f32 %v178_v48, %v177_v28 }
  0x2f   :  { %v156_v52 = vadd.f32 %v155_v33, %v154_v14  ;;  %v164_v53 = vrot.slane %v163_v35, 2  ;;  %v172_v57 = vadd.f32 %v171_v38, %v170_v18  ;;  %v307_v58 = vadd.f32 %v299_v25, %v131_v45  ;;  %v304_v38 = vld [vmem:[%s754_s2 + $0x28] sm:$0x1] }
  0x30   :  { %v148_v59 = vrot.slane %v147_v47, 1  ;;  %v121_v62 = vmul.f32 %v593_v40, %v591_v39  ;;  %v308_v63 = vadd.f32 %v300_v46, %v140_v51  ;;  %v180_v9 = vrot.slane %v179_v60, 4 }
  0x31   :  { %v157_v1 = vrot.slane %v156_v52, 1  ;;  %v165_v3 = vadd.f32 %v164_v53, %v163_v35  ;;  %v173_v4 = vrot.slane %v172_v57, 2  ;;  %316 = vst.msk [vmem:[%s754_s2] sm:$0x1] %vm315_vm1, %v307_v58  ;;  %v186_v10 = vsel %vm57_vm0, %v120_v50, 0.0 }
  0x32   :  { %v149_v5 = vadd.f32 %v148_v59, %v147_v47  ;;  %v187_v11 = vsel %vm57_vm0, %v121_v62, 0.0  ;;  %317 = vst.msk [vmem:[%s754_s2 + $0x8] sm:$0x1] %vm315_vm1, %v308_v63  ;;  %v181_v25 = vadd.f32 %v180_v9, %v179_v60  ;;  %v222_v26 = vrot.slane %v534_v37, 4  ;;  %v305_v63 = vld [vmem:[%s754_s2 + $0x30] sm:$0x1] }
  0x33   :  { %v158_v12 = vadd.f32 %v157_v1, %v156_v52  ;;  %v166_v13 = vrot.slane %v165_v3, 1  ;;  %v174_v14 = vadd.f32 %v173_v4, %v172_v57  ;;  %v188_v15 = vadd.f32 %v187_v11, %v186_v10  ;;  %v324_v10 = vld [vmem:[%s755_s3] sm:$0x1] }
  0x34   :  { %v309_v18 = vadd.f32 %v301_v0, %v149_v5  ;;  %v229_v27 = vsel %vm57_vm0, %v514_v24, 0.0  ;;  %v182_v45 = vrot.slane %v181_v25, 2  ;;  %v223_v46 = vadd.f32 %v222_v26, %v534_v37 }
  0x35   :  { %v310_v28 = vadd.f32 %v302_v6, %v158_v12  ;;  %v167_v32 = vadd.f32 %v166_v13, %v165_v3  ;;  %v175_v33 = vrot.slane %v174_v14, 1  ;;  %v189_v35 = vrot.slane %v188_v15, 4 }
  0x36   :  { %318 = vst.msk [vmem:[%s754_s2 + $0x10] sm:$0x1] %vm315_vm1, %v309_v18  ;;  %v230_v47 = vadd.f32 %v229_v27, %v546_v44  ;;  %v207_v24 = vadd.f32 %v509_v20, %v503_v16  ;;  %v208_v52 = vadd.f32 %v511_v21, %v505_v17  ;;  %v183_v53 = vadd.f32 %v182_v45, %v181_v25 }
  0x37   :  { %319 = vst.msk [vmem:[%s754_s2 + $0x18] sm:$0x1] %vm315_vm1, %v310_v28  ;;  %v311_v48 = vadd.f32 %v303_v23, %v167_v32  ;;  %v176_v50 = vadd.f32 %v175_v33, %v174_v14  ;;  %v190_v51 = vadd.f32 %v189_v35, %v188_v15  ;;  %v224_v57 = vrot.slane %v223_v46, 2  ;;  %v325_v32 = vld [vmem:[%s755_s3 + $0x8] sm:$0x1] }
  0x38   :  { %v231_v58 = vrot.slane %v230_v47, 4  ;;  %v237_v37 = vsel %vm57_vm0, %v207_v24, 0.0  ;;  %v238_v44 = vsel %vm57_vm0, %v208_v52, 0.0  ;;  %v209_v59 = vadd.f32 %v524_v31, %v520_v29 }
  0x39   :  { %320 = vst.msk [vmem:[%s754_s2 + $0x20] sm:$0x1] %vm315_vm1, %v311_v48  ;;  %v312_v16 = vadd.f32 %v304_v38, %v176_v50  ;;  %v191_v20 = vrot.slane %v190_v51, 2  ;;  %v184_v60 = vrot.slane %v183_v53, 1  ;;  %v225_v62 = vadd.f32 %v224_v57, %v223_v46 }
  0x3a   :  { %v232_v17 = vadd.f32 %v231_v58, %v230_v47  ;;  %v239_v21 = vadd.f32 %v238_v44, %v237_v37  ;;  %v210_v1 = vadd.f32 %v528_v34, %v522_v30  ;;  %v246_v3 = vsel %vm57_vm0, %v209_v59, 0.0 }
  0x3b   :  { %321 = vst.msk [vmem:[%s754_s2 + $0x28] sm:$0x1] %vm315_vm1, %v312_v16  ;;  %v192_v0 = vadd.f32 %v191_v20, %v190_v51  ;;  %v211_v29 = vadd.f32 %v541_v42, %v532_v36  ;;  %v185_v31 = vadd.f32 %v184_v60, %v183_v53  ;;  %v226_v4 = vrot.slane %v225_v62, 1  ;;  %v306_v36 = vld [vmem:[%s754_s2 + $0x38] sm:$0x1] }
  0x3c   :  { %v233_v5 = vrot.slane %v232_v17, 2  ;;  %v240_v6 = vrot.slane %v239_v21, 4  ;;  %v247_v11 = vsel %vm57_vm0, %v210_v1, 0.0  ;;  %v212_v12 = vadd.f32 %v543_v43, %v539_v41 }
  0x3d   :  { %v193_v9 = vrot.slane %v192_v0, 1  ;;  %v255_v30 = vsel %vm57_vm0, %v211_v29, 0.0  ;;  %v313_v34 = vadd.f32 %v305_v63, %v185_v31  ;;  %v227_v42 = vadd.f32 %v226_v4, %v225_v62 }
  0x3e   :  { %v234_v13 = vadd.f32 %v233_v5, %v232_v17  ;;  %v241_v14 = vadd.f32 %v240_v6, %v239_v21  ;;  %v248_v18 = vadd.f32 %v247_v11, %v246_v3  ;;  %v256_v23 = vsel %vm57_vm0, %v212_v12, 0.0  ;;  %v328_v3 = vld [vmem:[%s755_s3 + $0x20] sm:$0x1] }
  0x3f   :  { %v194_v15 = vadd.f32 %v193_v9, %v192_v0  ;;  %v213_v25 = vadd.f32 %v559_v55, %v552_v49  ;;  %322 = vst.msk [vmem:[%s754_s2 + $0x30] sm:$0x1] %vm315_vm1, %v313_v34  ;;  %v332_v41 = vadd.f32 %v324_v10, %v227_v42  ;;  %v257_v27 = vadd.f32 %v256_v23, %v255_v30  ;;  %v329_v30 = vld [vmem:[%s755_s3 + $0x28] sm:$0x1] }
  0x40   :  { %v235_v43 = vrot.slane %v234_v13, 1  ;;  %v242_v26 = vrot.slane %v241_v14, 2  ;;  %v249_v33 = vrot.slane %v248_v18, 4  ;;  %v214_v35 = vadd.f32 %v561_v56, %v557_v54 }
  0x41   :  { %v314_v28 = vadd.f32 %v306_v36, %v194_v15  ;;  %v264_v49 = vsel %vm57_vm0, %v213_v25, 0.0  ;;  %340 = vst.msk [vmem:[%s755_s3] sm:$0x1] %vm315_vm1, %v332_v41  ;;  %v258_v45 = vrot.slane %v257_v27, 4  ;;  %v215_v46 = vadd.f32 %v571_v2, %v566_v61  ;;  %v326_v61 = vld [vmem:[%s755_s3 + $0x10] sm:$0x1] }
  0x42   :  { %v236_v55 = vadd.f32 %v235_v43, %v234_v13  ;;  %v243_v38 = vadd.f32 %v242_v26, %v241_v14  ;;  %v250_v47 = vadd.f32 %v249_v33, %v248_v18  ;;  %v265_v54 = vsel %vm57_vm0, %v214_v35, 0.0  ;;  %v330_v13 = vld [vmem:[%s755_s3 + $0x30] sm:$0x1]  ;;  %v331_v41 = vld [vmem:[%s755_s3 + $0x38] sm:$0x1] }
  0x43   :  { %323 = vst.msk [vmem:[%s754_s2 + $0x38] sm:$0x1] %vm315_vm1, %v314_v28  ;;  %v216_v56 = vadd.f32 %v576_v8, %v574_v7  ;;  %v217_v24 = vadd.f32 %v583_v22, %v581_v19  ;;  %v259_v51 = vadd.f32 %v258_v45, %v257_v27  ;;  %v266_v52 = vadd.f32 %v265_v54, %v264_v49 }
  0x44   :  { %v333_v48 = vadd.f32 %v325_v32, %v236_v55  ;;  %v244_v50 = vrot.slane %v243_v38, 1  ;;  %v251_v2 = vrot.slane %v250_v47, 2  ;;  %v273_v53 = vsel %vm57_vm0, %v215_v46, 0.0 }
  0x45   :  { %v274_v57 = vsel %vm57_vm0, %v216_v56, 0.0  ;;  %v218_v58 = vadd.f32 %v593_v40, %v591_v39  ;;  %v260_v8 = vrot.slane %v259_v51, 2  ;;  %v267_v19 = vrot.slane %v266_v52, 4  ;;  %v327_v40 = vld [vmem:[%s755_s3 + $0x18] sm:$0x1] }
  0x46   :  { %341 = vst.msk [vmem:[%s755_s3 + $0x8] sm:$0x1] %vm315_vm1, %v333_v48  ;;  %v245_v7 = vadd.f32 %v244_v50, %v243_v38  ;;  %v275_v22 = vadd.f32 %v274_v57, %v273_v53  ;;  %v252_v37 = vadd.f32 %v251_v2, %v250_v47  ;;  %v282_v16 = vsel %vm57_vm0, %v217_v24, 0.0 }
  0x47   :  { %v283_v20 = vsel %vm57_vm0, %v218_v58, 0.0  ;;  %v261_v59 = vadd.f32 %v260_v8, %v259_v51  ;;  %v268_v60 = vadd.f32 %v267_v19, %v266_v52 }
  0x48   :  { %v334_v44 = vadd.f32 %v326_v61, %v245_v7  ;;  %v276_v62 = vrot.slane %v275_v22, 4  ;;  %v253_v17 = vrot.slane %v252_v37, 1  ;;  %v284_v39 = vadd.f32 %v283_v20, %v282_v16 }
  0x49   :  { %v262_v21 = vrot.slane %v261_v59, 1  ;;  %v269_v63 = vrot.slane %v268_v60, 2 }
  0x4a   :  { %342 = vst.msk [vmem:[%s755_s3 + $0x10] sm:$0x1] %vm315_vm1, %v334_v44  ;;  %v277_v0 = vadd.f32 %v276_v62, %v275_v22  ;;  %v254_v1 = vadd.f32 %v253_v17, %v252_v37  ;;  %v285_v29 = vrot.slane %v284_v39, 4 }
  0x4b   :  { %v263_v31 = vadd.f32 %v262_v21, %v261_v59  ;;  %v270_v4 = vadd.f32 %v269_v63, %v268_v60 }
  0x4c   :  { %v278_v5 = vrot.slane %v277_v0, 2  ;;  %v335_v6 = vadd.f32 %v327_v40, %v254_v1  ;;  %v286_v9 = vadd.f32 %v285_v29, %v284_v39 }
  0x4d   :  { %v336_v10 = vadd.f32 %v328_v3, %v263_v31  ;;  %v271_v11 = vrot.slane %v270_v4, 1 }
  0x4e   :  { %v279_v12 = vadd.f32 %v278_v5, %v277_v0  ;;  %343 = vst.msk [vmem:[%s755_s3 + $0x18] sm:$0x1] %vm315_vm1, %v335_v6  ;;  %v287_v34 = vrot.slane %v286_v9, 2 }
  0x4f   :  { %344 = vst.msk [vmem:[%s755_s3 + $0x20] sm:$0x1] %vm315_vm1, %v336_v10  ;;  %v272_v36 = vadd.f32 %v271_v11, %v270_v4 }
  0x50   :  { %v280_v42 = vrot.slane %v279_v12, 1  ;;  %v288_v14 = vadd.f32 %v287_v34, %v286_v9 }
  0x51   :  { %v337_v15 = vadd.f32 %v329_v30, %v272_v36 }
  0x52   :  { %v281_v18 = vadd.f32 %v280_v42, %v279_v12  ;;  %v289_v23 = vrot.slane %v288_v14, 1 }
  0x53   :  { %345 = vst.msk [vmem:[%s755_s3 + $0x28] sm:$0x1] %vm315_vm1, %v337_v15 }
  0x54   :  { %v338_v25 = vadd.f32 %v330_v13, %v281_v18  ;;  %v290_v43 = vadd.f32 %v289_v23, %v288_v14 }
  0x56   :  { %346 = vst.msk [vmem:[%s755_s3 + $0x30] sm:$0x1] %vm315_vm1, %v338_v25  ;;  %v339_v26 = vadd.f32 %v331_v41, %v290_v43 }
  0x58   :  { %347 = vst.msk [vmem:[%s755_s3 + $0x38] sm:$0x1] %vm315_vm1, %v339_v26 }
  0x59   :  { %356 = vsyncpa [#allocation3], 1 }
  0x5a   :  { %357 = vsyncpa [#allocation5], 1 }

</bundles_post_ra>
